<compile_context>
chip_gen: v6e
topology: v6e:2x2x1
jax: 0.10.0
libtpu: 0.0.40
codegen_flags: <defaults>
</compile_context>

<pallas_src>
import functools
import math

import jax
import jax.numpy as jnp
import numpy as np
from jax import lax
from jax.experimental import pallas as pl
from jax.experimental.pallas import tpu as pltpu

_INV_SQRT2 = 1.0 / math.sqrt(2.0)


def _critic_head_kernel(rep_ref, w1_ref, b1_ref, gw2_ref, scal_ref, out_ref):
    """One (TM, E) row tile: Linear(E,E) -> GELU(erf) -> folded LayerNorm+Linear(E,1)."""
    # Linear(E, E). w1 arrives pre-cast to bf16 from the wrapper; only the rep tile is
    # cast here. f32 accumulation on the MXU; all elementwise math below stays f32.
    # TODO(synk): have the upstream producer emit rep in bf16 (halves the HBM-bound
    # rep stream on v6e at moderate E) instead of casting the f32 tile in-kernel.
    x = rep_ref[...].astype(jnp.bfloat16)
    h = jnp.dot(x, w1_ref[...], preferred_element_type=jnp.float32)
    h = h + b1_ref[...]

    # GELU — exact (erf) variant, matching torch.nn.GELU() default. (On v5e the tanh
    # approximation would move this off the VALUs onto the EUP; kept exact for parity.)
    h = 0.5 * h * (1.0 + lax.erf(h * _INV_SQRT2))

    # LayerNorm (eps=1e-5) + affine + Linear(E,1), folded:
    #   v = rsqrt(var+eps) * (sum(h*gw2) - mean*S) + c
    # with gw2 = gamma*w2, S = sum(gw2), c = sum(beta*w2)+b2 precomputed in the wrapper.
    # Only two (TM, E) VPU passes (h*h, h*gw2) plus three XLU lane reductions.
    inv_e = 1.0 / h.shape[-1]
    mean = jnp.sum(h, axis=-1) * inv_e                 # (TM,)
    msq = jnp.sum(h * h, axis=-1) * inv_e              # (TM,)
    sg = jnp.sum(h * gw2_ref[...], axis=-1)            # (TM,)
    var = jnp.maximum(msq - mean * mean, 0.0)
    v = lax.rsqrt(var + 1e-5) * (sg - mean * scal_ref[0]) + scal_ref[1]

    # Lane-dense store: the 1-D (TM,) result is written as a (1, TM) row (unmasked vst)
    # instead of a (TM, 1) column (1 active lane per vreg + strided writeback DMA).
    out_ref[...] = v[None, :].astype(out_ref.dtype)


def _choose_tile_rows(n_rows, n_embd):
    """Rows per grid step: big enough to hide DMA / per-step overhead, VMEM-safe on v7x."""
    # Per-step working set ~ 24*TM*E bytes (2x f32 rep buffers, bf16 rep copy, h and
    # elementwise temporaries) on top of the resident bf16 w1 (counted at 2 buffers in
    # case single-buffering is unavailable). Target <= ~24 MiB so the pipeline also
    # fits v7x's 64 MiB physical / 32 MiB default-scoped VMEM with headroom.
    budget = 24 * 1024 * 1024 - 4 * n_embd * n_embd
    budget = max(budget, 4 * 1024 * 1024)
    tm = budget // (24 * n_embd)
    tm = min(tm, 16384)                     # keep rep tiles ~1-2 MiB+ even at small E
    if tm >= n_rows:
        return n_rows                       # single full-extent block (always legal)
    if tm >= 128:
        tm = (tm // 128) * 128              # full (8,128)/MXU tiles, no partial passes
    else:
        tm = max(8, (tm // 8) * 8)
    # TODO(synk): for E large enough that even bf16 w1 blows the budget (E >~ 3500),
    # K-tile the first matmul with pltpu.emit_pipeline instead of shrinking TM further.
    return tm


def _resident_spec(shape):
    """BlockSpec for a grid-invariant (VMEM-resident) input; single-buffer if possible."""
    index_map = lambda i: (0,) * len(shape)
    if hasattr(pl, "Buffered"):
        try:
            # Constant index_map -> nothing to pipeline; avoid the 2x VMEM of the
            # default double-buffering (matters for w1 under v7x's 64 MiB VMEM).
            return pl.BlockSpec(shape, index_map, pipeline_mode=pl.Buffered(1))
        except TypeError:
            pass
    return pl.BlockSpec(shape, index_map)


def critic_head(rep, w1, b1, gamma, beta, w2_row, b2):
    """head(rep) for rep of shape (N, E); returns (N, 1) float32 values."""
    n_rows, n_embd = rep.shape
    tm = _choose_tile_rows(n_rows, n_embd)
    n_tiles = (n_rows + tm - 1) // tm

    # Parameter prep (runs once per call, fused into the surrounding jit):
    w1_bf16 = w1.astype(jnp.bfloat16)                         # pre-cast weight for the MXU
    gw2 = (gamma * w2_row).astype(jnp.float32)                # (1, E)  gamma * w2
    s_fold = jnp.sum(gw2)                                     # sum(gamma * w2)
    c_fold = jnp.sum(beta * w2_row) + jnp.reshape(b2, ())     # sum(beta * w2) + b2
    scal = jnp.stack([s_fold, c_fold]).astype(jnp.float32)    # (2,) SMEM scalars

    # Explicit VMEM budget: rep double-buffer + bf16 copy + h/elementwise temporaries
    # + bf16 w1 (x2 in case Buffered(1) is unavailable) + small vectors + output bufs.
    bytes_req = (
        2 * tm * n_embd * 4        # double-buffered rep tiles (f32)
        + 2 * tm * n_embd          # in-kernel bf16 copy of the rep tile
        + 4 * tm * n_embd * 4      # h + fused elementwise temporaries (f32)
        + 2 * n_embd * n_embd * 2  # bf16 w1 (counted double-buffered for safety)
        + 2 * 2 * n_embd * 4       # b1 / gw2 rows
        + 2 * 2 * tm * 4           # output (1, tm) buffers
    )
    phys_vmem = 64 * 1024 * 1024
    try:
        phys_vmem = int(pltpu.get_tpu_info().vmem_capacity_bytes)
    except Exception:
        pass
    vmem_limit = int(min(max(bytes_req + (8 << 20), 32 << 20), (phys_vmem * 3) // 4))

    # NOTE: for best MXU/lane utilization E should be a multiple of 128; small E
    # (like the demo E=32) runs correctly but with masked (8,128) tiles.
    out = pl.pallas_call(
        _critic_head_kernel,
        out_shape=jax.ShapeDtypeStruct((n_tiles, tm), jnp.float32),
        grid=(n_tiles,),
        in_specs=[
            pl.BlockSpec((tm, n_embd), lambda i: (i, 0)),        # rep: row-tiled, pipelined
            _resident_spec((n_embd, n_embd)),                    # w1 (bf16), VMEM-resident
            _resident_spec((1, n_embd)),                         # b1
            _resident_spec((1, n_embd)),                         # gamma * w2
            pl.BlockSpec(memory_space=pltpu.MemorySpace.SMEM),   # [sum(gw2), sum(beta*w2)+b2]
        ],
        out_specs=pl.BlockSpec((1, tm), lambda i: (i, 0)),       # lane-dense row per tile
        compiler_params=pltpu.CompilerParams(
            dimension_semantics=("parallel",),   # rows independent -> megacore-shardable
            vmem_limit_bytes=vmem_limit,
        ),
    )(rep, w1_bf16, b1, gw2, scal)

    # Undo the lane-dense tiling: (n_tiles, tm) -> (N, 1); padded remainder rows dropped.
    return out.reshape(n_tiles * tm)[:n_rows].reshape(n_rows, 1)


@functools.partial(jax.jit, static_argnames=("num_agents",))
def critic_forward(obs, rep, params, num_agents):
    """Full Critic.forward (values path). Returns values of shape (B*A, 1)."""
    A = num_agents
    N = obs.shape[0]
    B = N // A
    w1, b1, gamma, beta, w2, b2 = params

    # Hot path (matmul / GELU / folded LayerNorm+projection) in the Pallas kernel.
    values = critic_head(rep, w1, b1, gamma, beta, w2.reshape(1, -1), b2)

    # Un-permutation gather (glue, plain JAX, fused into the same jit). Matches the
    # torch `.long()` truncation of the float index stored at obs[..., -6].
    reverse_perm_indices = obs[..., -6].astype(jnp.int32)
    batch_indices = jnp.repeat(jnp.arange(B, dtype=jnp.int32) * A, A)
    reverse_perm_indices = reverse_perm_indices + batch_indices
    return values[reverse_perm_indices]


def critic_forward_ref(obs, rep, params, num_agents):
    """Pure-JAX reference with the original (f32, two-pass LayerNorm) math."""
    w1, b1, gamma, beta, w2, b2 = params
    h = rep @ w1 + b1
    h = 0.5 * h * (1.0 + lax.erf(h * _INV_SQRT2))
    mean = h.mean(-1, keepdims=True)
    var = ((h - mean) ** 2).mean(-1, keepdims=True)
    h = (h - mean) / jnp.sqrt(var + 1e-5)
    h = h * gamma + beta
    values = h @ w2 + b2
    A = num_agents
    B = obs.shape[0] // A
    idx = obs[..., -6].astype(jnp.int32) + jnp.repeat(jnp.arange(B, dtype=jnp.int32) * A, A)
    return values[idx]


def make_params(key, n_embd):
    """Deterministic synthetic init mirroring the module's init_ (orthogonal, zero bias)."""
    k1, k2 = jax.random.split(key)
    gain_relu = math.sqrt(2.0)  # nn.init.calculate_gain('relu')
    # Linear(E, E): orthogonal with relu gain; stored as (in, out) so kernel does x @ W.
    w1 = gain_relu * jax.random.orthogonal(k1, n_embd, shape=()).astype(jnp.float32)
    b1 = jnp.zeros((1, n_embd), jnp.float32)
    # LayerNorm affine params.
    gamma = jnp.ones((1, n_embd), jnp.float32)
    beta = jnp.zeros((1, n_embd), jnp.float32)
    # Linear(E, 1): orthogonal with gain=0.01; stored as (in, out).
    w2_full = jax.random.orthogonal(k2, n_embd, shape=()).astype(jnp.float32)
    w2 = 0.01 * w2_full[:, :1]
    b2 = jnp.zeros((1, 1), jnp.float32)
    return (w1, b1, gamma, beta, w2, b2)


if __name__ == "__main__":
    B, A, E, OBS_DIM = 2, 4, 32, 16
    N = B * A

    key = jax.random.PRNGKey(0)
    k_obs, k_rep, k_perm, k_params = jax.random.split(key, 4)

    # obs_rep (the head input) and obs (carrying the permutation index at [..., -6]).
    rep = jax.random.normal(k_rep, (N, E), jnp.float32)
    obs = jax.random.normal(k_obs, (N, OBS_DIM), jnp.float32)

    # Per-batch permutation of agent indices stored at feature -6.
    perms = jnp.stack([jax.random.permutation(jax.random.fold_in(k_perm, b), A)
                       for b in range(B)]).reshape(-1).astype(jnp.float32)
    obs = obs.at[:, -6].set(perms)

    params = make_params(k_params, E)

    values = critic_forward(obs, rep, params, num_agents=A)
    jax.block_until_ready(values)
    assert values.shape == (N, 1)

    # Loose-tolerance parity check vs. the f32 reference (kernel matmul runs in bf16,
    # variance is one-pass E[h^2]-E[h]^2).
    ref = critic_forward_ref(obs, rep, params, num_agents=A)
    np.testing.assert_allclose(np.asarray(values), np.asarray(ref), rtol=5e-2, atol=5e-2)

    print("KERNEL_OK")
</pallas_src>

<mosaic_0001>
module attributes {stable_mosaic.version = 11 : i64} {
  func.func @_critic_head_kernel(%arg0: i32, %arg1: memref<8x32xf32, #tpu.memory_space<vmem>>, %arg2: memref<32x32xbf16, #tpu.memory_space<vmem>>, %arg3: memref<1x32xf32, #tpu.memory_space<vmem>>, %arg4: memref<1x32xf32, #tpu.memory_space<vmem>>, %arg5: memref<2xf32, #tpu.memory_space<smem>>, %arg6: memref<1x8xf32, #tpu.memory_space<vmem>>) attributes {dimension_semantics = [#tpu.dimension_semantics<parallel>], iteration_bounds = array<i64: 1>, scalar_prefetch = 0 : i64, scratch_operands = 0 : i64, tpu.core_type = #tpu.core_type<tc>, window_params = [{transform_indices = @transform_0, window_bounds = array<i64: 8, 32>}, {pipeline_mode = #tpu.pipeline_mode<synchronous>, transform_indices = @transform_1, window_bounds = array<i64: 32, 32>}, {pipeline_mode = #tpu.pipeline_mode<synchronous>, transform_indices = @transform_2, window_bounds = array<i64: 1, 32>}, {pipeline_mode = #tpu.pipeline_mode<synchronous>, transform_indices = @transform_3, window_bounds = array<i64: 1, 32>}, {transform_indices = @transform_4, window_bounds = array<i64: 2>}, {transform_indices = @transform_5, window_bounds = array<i64: 1, 8>}]} {
    %c0 = arith.constant 0 : index
    %c0_0 = arith.constant 0 : index
    %0 = vector.load %arg1[%c0, %c0_0] : memref<8x32xf32, #tpu.memory_space<vmem>>, vector<8x32xf32>
    %1 = arith.truncf %0 : vector<8x32xf32> to vector<8x32xbf16>
    %c0_1 = arith.constant 0 : index
    %c0_2 = arith.constant 0 : index
    %2 = vector.load %arg2[%c0_1, %c0_2] : memref<32x32xbf16, #tpu.memory_space<vmem>>, vector<32x32xbf16>
    %cst = arith.constant dense<0.000000e+00> : vector<8x32xf32>
    %3 = tpu.matmul %1, %2, %cst {dimension_numbers = #tpu.dot_dimension_numbers<[1], [0], [0], [1], [0, 0, 1, 1], [], []>} : vector<8x32xbf16>, vector<32x32xbf16>, vector<8x32xf32> -> vector<8x32xf32>
    %c0_3 = arith.constant 0 : index
    %c0_4 = arith.constant 0 : index
    %4 = vector.load %arg3[%c0_3, %c0_4] : memref<1x32xf32, #tpu.memory_space<vmem>>, vector<1x32xf32>
    %5 = vector.broadcast %4 : vector<1x32xf32> to vector<8x32xf32>
    %6 = arith.addf %3, %5 : vector<8x32xf32>
    %cst_5 = arith.constant 5.000000e-01 : f32
    %7 = vector.broadcast %cst_5 : f32 to vector<8x32xf32>
    %8 = arith.mulf %7, %6 : vector<8x32xf32>
    %cst_6 = arith.constant 0.707106769 : f32
    %9 = vector.broadcast %cst_6 : f32 to vector<8x32xf32>
    %10 = arith.mulf %6, %9 : vector<8x32xf32>
    %11 = math.erf %10 : vector<8x32xf32>
    %cst_7 = arith.constant 1.000000e+00 : f32
    %12 = vector.broadcast %cst_7 : f32 to vector<8x32xf32>
    %13 = arith.addf %12, %11 : vector<8x32xf32>
    %14 = arith.mulf %8, %13 : vector<8x32xf32>
    %cst_8 = arith.constant dense<0.000000e+00> : vector<8xf32>
    %15 = vector.multi_reduction <add>, %14, %cst_8 [1] : vector<8x32xf32> to vector<8xf32>
    %cst_9 = arith.constant 3.125000e-02 : f32
    %16 = vector.broadcast %cst_9 : f32 to vector<8xf32>
    %17 = arith.mulf %15, %16 : vector<8xf32>
    %18 = arith.mulf %14, %14 : vector<8x32xf32>
    %cst_10 = arith.constant dense<0.000000e+00> : vector<8xf32>
    %19 = vector.multi_reduction <add>, %18, %cst_10 [1] : vector<8x32xf32> to vector<8xf32>
    %cst_11 = arith.constant 3.125000e-02 : f32
    %20 = vector.broadcast %cst_11 : f32 to vector<8xf32>
    %21 = arith.mulf %19, %20 : vector<8xf32>
    %c0_12 = arith.constant 0 : index
    %c0_13 = arith.constant 0 : index
    %22 = vector.load %arg4[%c0_12, %c0_13] : memref<1x32xf32, #tpu.memory_space<vmem>>, vector<1x32xf32>
    %23 = vector.broadcast %22 : vector<1x32xf32> to vector<8x32xf32>
    %24 = arith.mulf %14, %23 : vector<8x32xf32>
    %cst_14 = arith.constant dense<0.000000e+00> : vector<8xf32>
    %25 = vector.multi_reduction <add>, %24, %cst_14 [1] : vector<8x32xf32> to vector<8xf32>
    %26 = arith.mulf %17, %17 : vector<8xf32>
    %27 = arith.subf %21, %26 : vector<8xf32>
    %cst_15 = arith.constant 0.000000e+00 : f32
    %28 = vector.broadcast %cst_15 : f32 to vector<8xf32>
    %29 = arith.maximumf %27, %28 : vector<8xf32>
    %cst_16 = arith.constant 9.99999974E-6 : f32
    %30 = vector.broadcast %cst_16 : f32 to vector<8xf32>
    %31 = arith.addf %29, %30 : vector<8xf32>
    %32 = math.rsqrt %31 : vector<8xf32>
    %c0_17 = arith.constant 0 : index
    %33 = memref.load %arg5[%c0_17] : memref<2xf32, #tpu.memory_space<smem>>
    %34 = vector.broadcast %33 : f32 to vector<8xf32>
    %35 = arith.mulf %17, %34 : vector<8xf32>
    %36 = arith.subf %25, %35 : vector<8xf32>
    %37 = arith.mulf %32, %36 : vector<8xf32>
    %c1 = arith.constant 1 : index
    %38 = memref.load %arg5[%c1] : memref<2xf32, #tpu.memory_space<smem>>
    %39 = vector.broadcast %38 : f32 to vector<8xf32>
    %40 = arith.addf %37, %39 : vector<8xf32>
    %41 = vector.shape_cast %40 : vector<8xf32> to vector<1x8xf32>
    %c0_18 = arith.constant 0 : index
    %c0_19 = arith.constant 0 : index
    %42 = vector.load %arg6[%c0_18, %c0_19] : memref<1x8xf32, #tpu.memory_space<vmem>>, vector<1x8xf32>
    tpu.vector_store %arg6[%c0_18, %c0_19], %41 {strides = array<i32>} : memref<1x8xf32, #tpu.memory_space<vmem>>, vector<1x8xf32>,
    return
  }
  func.func @transform_0(%arg0: i32) -> (i32, i32) {
    %c0_i32 = arith.constant 0 : i32
    %c0_i32_0 = arith.constant 0 : i32
    return %arg0, %c0_i32 : i32, i32
  }
  func.func @transform_1(%arg0: i32) -> (i32, i32) {
    %c0_i32 = arith.constant 0 : i32
    %c0_i32_0 = arith.constant 0 : i32
    %c0_i32_1 = arith.constant 0 : i32
    return %c0_i32, %c0_i32_0 : i32, i32
  }
  func.func @transform_2(%arg0: i32) -> (i32, i32) {
    %c0_i32 = arith.constant 0 : i32
    %c0_i32_0 = arith.constant 0 : i32
    %c0_i32_1 = arith.constant 0 : i32
    return %c0_i32, %c0_i32_0 : i32, i32
  }
  func.func @transform_3(%arg0: i32) -> (i32, i32) {
    %c0_i32 = arith.constant 0 : i32
    %c0_i32_0 = arith.constant 0 : i32
    %c0_i32_1 = arith.constant 0 : i32
    return %c0_i32, %c0_i32_0 : i32, i32
  }
  func.func @transform_4(%arg0: i32) -> i32 {
    %c0_i32 = arith.constant 0 : i32
    %c0_i32_0 = arith.constant 0 : i32
    return %c0_i32 : i32
  }
  func.func @transform_5(%arg0: i32) -> (i32, i32) {
    %c0_i32 = arith.constant 0 : i32
    %c0_i32_0 = arith.constant 0 : i32
    return %arg0, %c0_i32 : i32, i32
  }
}

</mosaic_0001>

<bundles_post_ra>
// kernel: critic_forward.1
= control target key start
LH: loop header
LB: loop body
LE: loop exit
PB: predicated region body
PF: predicated region fallthrough
CT: control target
= control target key end

     0   :  { %10 = vsyncpa [#allocation3], 0  ;;  %s254_s0 = inlined_call_operand.vmem [shape: f32[8,32], index: 0, kind: input, shape index: {}]   ;;  %s255_s1 = inlined_call_operand.vmem [shape: bf16[32,32], index: 1, kind: input, shape index: {}]   ;;  %s256_s2 = inlined_call_operand.vmem [shape: f32[1,32], index: 2, kind: input, shape index: {}]   ;;  %s257_s3 = inlined_call_operand.vmem [shape: f32[1,32], index: 3, kind: input, shape index: {}]   ;;  %s258_s4 = inlined_call_operand.vmem [shape: f32[2], index: 4, kind: input, shape index: {}]   ;;  %s259_s5 = inlined_call_operand.vmem [shape: f32[1,8], index: 5, kind: output, shape index: {}]  }
   0x1   :  { %s25_s20 = sshll.u32 %s258_s4, 4  ;;  %s26_s20 = int_to_ptr.vmem [resolvable:$true] %s25_s20 }
   0x2   :  { %s182_s21 = scalar_lea.vmem %s26_s20, 16  ;;  %p187_p1 = scmp.lt.s32.totalorder %s26_s20, %s26_s20 }
   0x3   :  { %p183_p0 = scmp.ne.s32.totalorder %s26_s20, %s182_s21  ;;  %p188_p2 = scmp.lt.s32.totalorder %s182_s21, %s182_s21 }
   0x5   :  { %p189_p3 = por %p188_p2, %p187_p1 }
   0x7   :  { %p190_p4 = pnand %p189_p3, %p183_p0 }
   0x9   :  { %193 = shalt.err (!%p190_p4)
}
   0xa   :  { %s196_s22 = smov [#allocation2]  }
   0xb   :  { %28 = dma.vmem_to_smem %s26_s20, 16, %s196_s22, [#allocation3]  }
   0xc   :  { %194 = dma.done.wait [#allocation3], 16  }
   0xd   :  { %195 = vsyncadd [#allocation3], 4294967280 }
   0xe   :  { %32 = sfence }
   0xf   :  { %v176_v0 = vld [vmem:[%s255_s1 + $0x8] sm:$0xff]   ;;  %v197_v1 = vmov 0.0   ;;  %v177_v2 = vld [vmem:[%s255_s1] sm:$0xff]   ;;  %vm198_vm0 = vmmov 0   ;;  %vm59_vm1 = vcmask 261120   ;;  %v142_v31 = vlaneseq }
  0x10   :  { %165 = vmatprep.subr.bf16.mxu0 %v197_v1  ;;  %169 = vmatprep.mubr.msk.bf16.mxu0 %vm198_vm0, %v197_v1  ;;  %v34_v3 = vld [vmem:[%s254_s0] sm:$0xff]  ;;  %vm149_vm2 = vcmask 57344  }
  0x11   :  { %166 = vmatpush3.bf16.msra.mxu0 %v176_v0  ;;  %v35_v4 = vpack.c.bf16 %v34_v3, %v34_v3  ;;  %v156_v5 = vld [vmem:[%s256_s2] ss:$0 sm:$0xff]  ;;  %s133_s2 = sld [smem:[#allocation2]]  ;;  %v143_v33 = vand.u32 127, %v142_v31  ;;  %v145_v34 = vshrl.u32 %v142_v31, 7 }
  0x12   :  { %167 = vmatprep.subr.bf16.mxu0 %v197_v1  ;;  %v160_v15 = vld [vmem:[%s257_s3] ss:$0 sm:$0xff]  ;;  %s161_s3 = sld [smem:[#allocation2 + $0x1]] }
  0x13   :  { %v146_v39 = vsub.s32 %v143_v33, %v145_v34 }
  0x15   :  { %168 = vmatpush3.bf16.msra.mxu0 %v177_v2 }
  0x17   :  { %v134_v30 = vstv %s133_s2 }
  0x18   :  { %170 = vmatmul.mubr.msk.bf16.vlgmr.msra.gmra.mxu0 %vm59_vm1, %v35_v4  ;;  %v139_v38 = vstv %s161_s3 }
  0xd8   :  { %v97_v6 = vpop.f32.mrf.mxu0 }
  0xd9   :  { %v98_v7 = vadd.f32 %v156_v5, %v97_v6 }
  0xda   :  { %v171_v8 = vpop.f32.mrf.mxu0 }
  0xdb   :  { %v104_v9 = vmul.f32 0.70710677, %v98_v7  ;;  %v103_v13 = vmul.f32 0.5, %v98_v7 }
  0xdc   :  { %v100_v10 = vpop.f32.mrf.mxu0 }
  0xdd   :  { %178 = verf.f32 %v104_v9 }
  0xde   :  { %v172_v11 = vpop.f32.mrf.mxu0 }
  0xea   :  { %v179_v12 = vpop.eup %178 }
  0xeb   :  { %v106_v14 = vadd.f32 1.0, %v179_v12 }
  0xed   :  { %v107_v16 = vmul.f32 %v106_v14, %v103_v13 }
  0xef   :  { %v108_v17 = vsel %vm59_vm1, %v107_v16, 0.0  ;;  %v124_v18 = vmul.f32 %v160_v15, %v107_v16  ;;  %v112_v19 = vmul.f32 %v107_v16, %v107_v16 }
  0xf0   :  { %109 = vadd.xlane.f32.xlu0 %v108_v17 }
  0xf1   :  { %v125_v20 = vsel %vm59_vm1, %v124_v18, 0.0  ;;  %v113_v21 = vsel %vm59_vm1, %v112_v19, 0.0 }
  0xf2   :  { %126 = vadd.xlane.f32.xlu1 %v125_v20 }
  0xf4   :  { %114 = vadd.xlane.f32.xlu0 %v113_v21 }
 0x179   :  { %v110_v22 = vpop.xlane.xlu0 %109 }
 0x17a   :  { %v111_v23 = vmul.f32 0.03125, %v110_v22 }
 0x17b   :  { %v127_v35 = vpop.xlane.xlu1 %126 }
 0x17c   :  { %v128_v25 = vmul.f32 %v111_v23, %v111_v23  ;;  %v135_v32 = vmul.f32 %v134_v30, %v111_v23 }
 0x17d   :  { %v115_v24 = vpop.xlane.xlu0 %114 }
 0x17e   :  { %v116_v26 = vmul.f32 0.03125, %v115_v24  ;;  %v136_v36 = vsub.f32 %v127_v35, %v135_v32 }
 0x180   :  { %v129_v27 = vsub.f32 %v116_v26, %v128_v25 }
 0x182   :  { %v130_v28 = vmax.f32 %v129_v27, 0.0 }
 0x184   :  { %v131_v29 = vadd.f32 1e-05, %v130_v28 }
 0x186   :  { %180 = vrsqrt.f32 %v131_v29 }
 0x193   :  { %v181_v37 = vpop.eup %180 }
 0x194   :  { %v137_v40 = vmul.f32 %v181_v37, %v136_v36 }
 0x196   :  { %v140_v41 = vadd.f32 %v139_v38, %v137_v40 }
 0x198   :  { %v147_v42 = vrot.slane %v140_v41, %v146_v39 }
 0x19a   :  { %150 = vst.msk [vmem:[%s259_s5] sm:$0x1] %vm149_vm2, %v147_v42 }
 0x19b   :  { %155 = vsyncpa [#allocation3], 1 }

</bundles_post_ra>
